<compile_context>
chip_gen: v7x
topology: tpu7x:2x2x1
jax: 0.10.0
libtpu: 0.0.40
codegen_flags: <defaults>
</compile_context>

<pallas_src>
import math
import numpy as np
import jax
import jax.numpy as jnp
from jax.experimental import pallas as pl
from jax.experimental.pallas import tpu as pltpu


# ----------------------------------------------------------------------------
# Static band-matrix construction (numpy, trace-time only).
# ----------------------------------------------------------------------------
def _band_1d(in_size, out_size, k, d, s, pad_before):
    """0/1 matrix folding the k taps, padding/cropping and stride of an
    all-ones conv along one axis: out[jo] = sum_i x[i] * band[i, jo]."""
    band = np.zeros((in_size, out_size), np.float32)
    for jo in range(out_size):
        for kj in range(k):
            idx = jo * s + kj * d - pad_before
            if 0 <= idx < in_size:
                band[idx, jo] += 1.0
    return band


def _round_up(v, m):
    return -(-v // m) * m


def _vmem_limit_bytes():
    """Generation-aware scoped-VMEM limit: physical per-TC VMEM minus ~25%
    headroom for compiler-internal scratch (v7x has only 64 MiB/TC)."""
    cap = 64 << 20  # conservative default == v7x per-TC VMEM
    try:
        info = pltpu.get_tpu_info()
        cap = int(getattr(info, "vmem_capacity_bytes", cap))
    except Exception:
        pass
    return int(cap * 3 // 4)


def _pick_row_block(total_rows, in_cols, out_cols, itemsize, vmem_limit,
                    band_bytes, min_steps=2):
    """Rows of the flattened (N*C, H*W) input per grid step: as large as the
    VMEM budget allows (amortizes per-step overhead, big DMAs), while keeping
    >= min_steps grid steps on large problems so the BlockSpec pipeline can
    overlap DMAs and v7x can shard the 'parallel' axis over both TensorCores."""
    row_bytes = (_round_up(in_cols, 128) + _round_up(out_cols, 128)) * itemsize
    # Double-buffered in+out blocks get ~half the scoped limit; the band
    # (double-buffered by default but DMA'd only once) and compiler internal
    # scratch get the rest.
    budget = max(vmem_limit // 2 - 2 * band_bytes, 1 << 20)
    rb = max(8, (budget // (2 * row_bytes)) // 8 * 8)
    if rb >= total_rows:
        rb = total_rows  # whole array in one (full-extent) block
        if total_rows > 8 * min_steps:
            # Problem is big enough: split for pipelining / dual-TC sharding.
            rb = _round_up(-(-total_rows // min_steps), 8)
    return rb


# ----------------------------------------------------------------------------
# Pallas kernel: one lane-dense MXU matmul per row block.
# ----------------------------------------------------------------------------
def _product_kernel(x_ref, band_ref, o_ref):
    o_ref[...] = jnp.dot(
        x_ref[...], band_ref[...],
        preferred_element_type=jnp.float32,
        precision=jax.lax.Precision.HIGHEST,
    ).astype(o_ref.dtype)


# ----------------------------------------------------------------------------
# Layer wrapper (mirrors deeprob.spn.layers.dgcspn.SpatialProductLayer).
# ----------------------------------------------------------------------------
class SpatialProductLayer:
    """JAX/Pallas port of deeprob's SpatialProductLayer (depthwise=True)."""

    def __init__(self, in_features, kernel_size, padding, stride, dilation,
                 depthwise=True):
        self.in_features = tuple(in_features)
        if isinstance(kernel_size, int):
            kernel_size = (kernel_size, kernel_size)
        if isinstance(stride, int):
            stride = (stride, stride)
        if isinstance(dilation, int):
            dilation = (dilation, dilation)
        self.kernel_size = tuple(kernel_size)
        self.stride = tuple(stride)
        self.dilation = tuple(dilation)

        in_c, in_h, in_w = self.in_features
        kh, kw = self.kernel_size
        keh = (kh - 1) * self.dilation[0] + 1
        kew = (kw - 1) * self.dilation[1] + 1

        if padding == 'valid':
            self.pad = [0, 0, 0, 0]
        elif padding == 'full':
            self.pad = [kew - 1, kew - 1, keh - 1, keh - 1]
        elif padding == 'final':
            self.pad = [0, (kew - 1) * 2 - in_w, 0, (keh - 1) * 2 - in_h]
        else:
            raise ValueError("Padding mode must be either 'valid', 'full' or 'final'")

        if not depthwise:
            # TODO(synk): depthwise=False (sparse one-hot kernels, out_c = C**(kh*kw))
            # is not implemented in the Pallas path.
            raise NotImplementedError("Only depthwise=True is implemented in Pallas.")

        pre_h = self.pad[2] + self.pad[3] + in_h - keh + 1
        pre_w = self.pad[0] + self.pad[1] + in_w - kew + 1
        # ceil(u/s) == floor((u-1)/s)+1 (the conv formula) only for u >= 1;
        # guard so a degenerate config errors instead of silently mismatching.
        if pre_h < 1 or pre_w < 1:
            raise ValueError("Degenerate output extent: pre-stride size < 1 "
                             f"(pre_h={pre_h}, pre_w={pre_w})")
        out_h = int(math.ceil(pre_h / self.stride[0]))
        out_w = int(math.ceil(pre_w / self.stride[1]))
        self.out_features = (in_c, out_h, out_w)

        # Deterministic parameters (all-ones depthwise kernel) — used by references.
        self.weight = jnp.ones((in_c, 1, kh, kw), jnp.float32)

        # Static fused band: kron(bandH (H,out_h), bandW (W,out_w)) so that
        # band[h*W + w, io*out_w + jo] = bandH[h, io] * bandW[w, jo].
        band_h = _band_1d(in_h, out_h, kh, self.dilation[0], self.stride[0], self.pad[2])
        band_w = _band_1d(in_w, out_w, kw, self.dilation[1], self.stride[1], self.pad[0])
        self._band_np = np.kron(band_h, band_w)  # (H*W, out_h*out_w)

    def __call__(self, x):
        n, c, h, w = x.shape
        assert (c, h, w) == self.in_features
        _, out_h, out_w = self.out_features
        hw, ohw = h * w, out_h * out_w
        total_rows = n * c
        itemsize = x.dtype.itemsize

        band = jnp.asarray(self._band_np, dtype=x.dtype)

        vmem_limit = _vmem_limit_bytes()
        band_bytes = _round_up(hw, 8) * _round_up(ohw, 128) * itemsize
        rb = _pick_row_block(total_rows, hw, ohw, itemsize, vmem_limit, band_bytes)
        grid = (pl.cdiv(total_rows, rb),)

        # Metadata-only reshapes for contiguous NCHW: no extra HBM pass.
        x2 = x.reshape(total_rows, hw)

        cost = pl.CostEstimate(
            flops=2 * total_rows * hw * ohw,
            transcendentals=0,
            bytes_accessed=(total_rows * (hw + ohw) + hw * ohw) * itemsize)

        out2 = pl.pallas_call(
            _product_kernel,
            out_shape=jax.ShapeDtypeStruct((total_rows, ohw), x.dtype),
            grid=grid,
            in_specs=[
                pl.BlockSpec((rb, hw), lambda i: (i, 0)),
                # Constant block index -> DMA'd once across the whole grid.
                pl.BlockSpec((hw, ohw), lambda i: (0, 0)),
            ],
            out_specs=pl.BlockSpec((rb, ohw), lambda i: (i, 0)),
            compiler_params=pltpu.CompilerParams(
                # 1-D "parallel" axis: also lets v7x shard grid steps over
                # both TensorCores (>= 2 steps are kept on large problems).
                dimension_semantics=("parallel",),
                vmem_limit_bytes=vmem_limit),
            cost_estimate=cost,
        )(x2, band)

        return out2.reshape(n, c, out_h, out_w)


# ----------------------------------------------------------------------------
# Pure-JAX reference (identical semantics: F.pad + grouped conv2d).
# ----------------------------------------------------------------------------
def _pad_or_crop_nchw(x, top, bottom, left, right):
    """Mimics F.pad(x, [left, right, top, bottom]) incl. negative (crop) pads."""
    tp, tcrop = max(top, 0), max(-top, 0)
    bp, bcrop = max(bottom, 0), max(-bottom, 0)
    lp, lcrop = max(left, 0), max(-left, 0)
    rp, rcrop = max(right, 0), max(-right, 0)
    if tp or bp or lp or rp:
        x = jnp.pad(x, ((0, 0), (0, 0), (tp, bp), (lp, rp)))
    hh, ww = x.shape[2], x.shape[3]
    return x[:, :, tcrop:hh - bcrop, lcrop:ww - rcrop]


def _reference(layer, x):
    left, right, top, bottom = layer.pad
    xp = _pad_or_crop_nchw(x, top, bottom, left, right)
    return jax.lax.conv_general_dilated(
        xp, layer.weight, window_strides=layer.stride, padding='VALID',
        rhs_dilation=layer.dilation, feature_group_count=x.shape[1],
        dimension_numbers=('NCHW', 'OIHW', 'NCHW'))


if __name__ == "__main__":
    key = jax.random.PRNGKey(0)
    N, C, H, W = 2, 4, 16, 16
    x = jax.random.normal(key, (N, C, H, W), dtype=jnp.float32)  # e.g. log-probs

    configs = [
        dict(kernel_size=2, padding='full', stride=2, dilation=1),   # strided path
        dict(kernel_size=3, padding='valid', stride=1, dilation=2),  # dilated path
        dict(kernel_size=2, padding='final', stride=1, dilation=1),  # crop path
    ]
    for cfg in configs:
        layer = SpatialProductLayer((C, H, W), depthwise=True, **cfg)
        y = jax.block_until_ready(layer(x))
        ref = _reference(layer, x)
        assert y.shape == (N,) + layer.out_features, (cfg, y.shape, layer.out_features)
        assert jnp.allclose(y, ref, atol=1e-5, rtol=1e-5), (cfg, "mismatch vs reference conv")

    print("KERNEL_OK")
</pallas_src>

<mosaic_0001>
module attributes {stable_mosaic.version = 11 : i64} {
  func.func @_product_kernel(%arg0: i32, %arg1: memref<8x256xf32, #tpu.memory_space<vmem>>, %arg2: memref<256x81xf32, #tpu.memory_space<vmem>>, %arg3: memref<8x81xf32, #tpu.memory_space<vmem>>) attributes {dimension_semantics = [#tpu.dimension_semantics<parallel>], iteration_bounds = array<i64: 1>, scalar_prefetch = 0 : i64, scratch_operands = 0 : i64, tpu.core_type = #tpu.core_type<tc>, window_params = [{transform_indices = @transform_0, window_bounds = array<i64: 8, 256>}, {pipeline_mode = #tpu.pipeline_mode<synchronous>, transform_indices = @transform_1, window_bounds = array<i64: 256, 81>}, {transform_indices = @transform_2, window_bounds = array<i64: 8, 81>}]} {
    %c0 = arith.constant 0 : index
    %c0_0 = arith.constant 0 : index
    %0 = vector.load %arg1[%c0, %c0_0] : memref<8x256xf32, #tpu.memory_space<vmem>>, vector<8x256xf32>
    %c0_1 = arith.constant 0 : index
    %c0_2 = arith.constant 0 : index
    %1 = vector.load %arg2[%c0_1, %c0_2] : memref<256x81xf32, #tpu.memory_space<vmem>>, vector<256x81xf32>
    %cst = arith.constant dense<0.000000e+00> : vector<8x81xf32>
    %2 = tpu.matmul %0, %1, %cst {dimension_numbers = #tpu.dot_dimension_numbers<[1], [0], [0], [1], [0, 0, 1, 1], [], []>, precision = #tpu.contract_precision<fp32>} : vector<8x256xf32>, vector<256x81xf32>, vector<8x81xf32> -> vector<8x81xf32>
    %c0_3 = arith.constant 0 : index
    %c0_4 = arith.constant 0 : index
    %3 = vector.load %arg3[%c0_3, %c0_4] : memref<8x81xf32, #tpu.memory_space<vmem>>, vector<8x81xf32>
    tpu.vector_store %arg3[%c0_3, %c0_4], %2 {strides = array<i32>} : memref<8x81xf32, #tpu.memory_space<vmem>>, vector<8x81xf32>,
    return
  }
  func.func @transform_0(%arg0: i32) -> (i32, i32) {
    %c0_i32 = arith.constant 0 : i32
    %c0_i32_0 = arith.constant 0 : i32
    return %arg0, %c0_i32 : i32, i32
  }
  func.func @transform_1(%arg0: i32) -> (i32, i32) {
    %c0_i32 = arith.constant 0 : i32
    %c0_i32_0 = arith.constant 0 : i32
    %c0_i32_1 = arith.constant 0 : i32
    return %c0_i32, %c0_i32_0 : i32, i32
  }
  func.func @transform_2(%arg0: i32) -> (i32, i32) {
    %c0_i32 = arith.constant 0 : i32
    %c0_i32_0 = arith.constant 0 : i32
    return %arg0, %c0_i32 : i32, i32
  }
}

</mosaic_0001>

<bundles_post_ra>
// kernel: tpu_custom_call.1
= control target key start
LH: loop header
LB: loop body
LE: loop exit
PB: predicated region body
PF: predicated region fallthrough
CT: control target
= control target key end

     0   :  { %s1879_s0 = inlined_call_operand.vmem [shape: f32[8,256], index: 0, kind: input, shape index: {}]   ;;  %s1880_s1 = inlined_call_operand.vmem [shape: f32[256,81], index: 1, kind: input, shape index: {}]   ;;  %s1881_s2 = inlined_call_operand.hbm [shape: f32[8,81], index: 2, kind: output, shape index: {}]  }
   0x1   :  { %v30_v0 = vld [vmem:[%s1880_s1 + $0x80] sm:$0xff]  ;;  %v31_v1 = vld [vmem:[%s1880_s1 + $0x88] sm:$0xff]  ;;  %v32_v7 = vld [vmem:[%s1880_s1 + $0x90] sm:$0xff] }
   0x2   :  { %v14_v2 = vld [vmem:[%s1880_s1] sm:$0xff]  ;;  %v95_v3 = vand.u32 4294901760, %v30_v0  ;;  %v98_v4 = vand.u32 4294901760, %v31_v1  ;;  %v15_v5 = vld [vmem:[%s1880_s1 + $0x8] sm:$0xff]  ;;  %v33_v8 = vld [vmem:[%s1880_s1 + $0x98] sm:$0xff]  ;;  %v101_v10 = vand.u32 4294901760, %v32_v7 }
   0x3   :  { %v47_v6 = vand.u32 4294901760, %v14_v2  ;;  %v50_v9 = vand.u32 4294901760, %v15_v5  ;;  %v104_v11 = vand.u32 4294901760, %v33_v8  ;;  %v16_v12 = vld [vmem:[%s1880_s1 + $0x10] sm:$0xff]  ;;  %v17_v13 = vld [vmem:[%s1880_s1 + $0x18] sm:$0xff]  ;;  %v34_v18 = vld [vmem:[%s1880_s1 + $0xa0] sm:$0xff] }
   0x4   :  { %v1391_v14 = vpack.c.bf16 %v98_v4, %v95_v3  ;;  %v53_v16 = vand.u32 4294901760, %v16_v12  ;;  %v56_v17 = vand.u32 4294901760, %v17_v13  ;;  %v35_v19 = vld [vmem:[%s1880_s1 + $0xa8] sm:$0xff]  ;;  %v18_v23 = vld [vmem:[%s1880_s1 + $0x20] sm:$0xff]  ;;  %v1414_v25 = vsub.f32 %v32_v7, %v101_v10  ;;  %v36_v37 = vld [vmem:[%s1880_s1 + $0xb0] sm:$0xff] }
   0x5   :  { %v1393_v15 = vsub.f32 %v14_v2, %v47_v6  ;;  %v1401_v20 = vpack.c.bf16 %v50_v9, %v47_v6  ;;  %v1403_v21 = vsub.f32 %v15_v5, %v50_v9  ;;  %v1405_v22 = vpack.c.bf16 %v104_v11, %v101_v10  ;;  %v19_v24 = vld [vmem:[%s1880_s1 + $0x28] sm:$0xff]  ;;  %v37_v42 = vld [vmem:[%s1880_s1 + $0xb8] sm:$0xff]  ;;  %v20_v55 = vld [vmem:[%s1880_s1 + $0x30] sm:$0xff] }
   0x6   :  { %1135 = vmatprep.subr.bf16.mxu0 %v1391_v14  ;;  %v1416_v26 = vsub.f32 %v33_v8, %v104_v11  ;;  %v1418_v27 = vpack.c.bf16 %v56_v17, %v53_v16  ;;  %v1420_v28 = vsub.f32 %v16_v12, %v53_v16  ;;  %v107_v29 = vand.u32 4294901760, %v34_v18  ;;  %v21_v56 = vld [vmem:[%s1880_s1 + $0x38] sm:$0xff] }
   0x7   :  { %1137 = vmatpush3.bf16.msra.mxu0 %v1401_v20  ;;  %v110_v30 = vand.u32 4294901760, %v35_v19  ;;  %v1423_v31 = vsub.f32 %v30_v0, %v95_v3  ;;  %v1425_v32 = vsub.f32 %v31_v1, %v98_v4  ;;  %v59_v33 = vand.u32 4294901760, %v18_v23 }
   0x8   :  { %1139 = vmatprep.subr.bf16.mxu0 %v1405_v22  ;;  %v62_v34 = vand.u32 4294901760, %v19_v24  ;;  %v1898_v35 = vand.u32 4294901760, %v1393_v15  ;;  %v1897_v36 = vand.u32 4294901760, %v1403_v21  ;;  %v1433_v38 = vsub.f32 %v17_v13, %v56_v17 }
   0x9   :  { %v1435_v39 = vpack.c.bf16 %v110_v30, %v107_v29  ;;  %v1437_v40 = vsub.f32 %v34_v18, %v107_v29  ;;  %v1903_v41 = vand.u32 4294901760, %v1423_v31  ;;  %v1443_v43 = vsub.f32 %v35_v19, %v110_v30 }
   0xa   :  { %v1900_v44 = vand.u32 4294901760, %v1425_v32  ;;  %v1446_v45 = vpack.c.bf16 %v62_v34, %v59_v33  ;;  %v1448_v46 = vsub.f32 %v18_v23, %v59_v33  ;;  %v162_v48 = vsub.f32 %v1393_v15, %v1898_v35 }
   0xb   :  { %1141 = vmatpush3.bf16.msra.mxu0 %v1418_v27  ;;  %v274_v47 = vsub.f32 %v1423_v31, %v1903_v41  ;;  %v169_v49 = vsub.f32 %v1403_v21, %v1897_v36  ;;  %v113_v50 = vand.u32 4294901760, %v36_v37  ;;  %v116_v52 = vand.u32 4294901760, %v37_v42 }
   0xc   :  { %1143 = vmatprep.subr.bf16.mxu0 %v1435_v39  ;;  %v281_v51 = vsub.f32 %v1425_v32, %v1900_v44  ;;  %v1895_v53 = vand.u32 4294901760, %v1414_v25  ;;  %v1894_v54 = vand.u32 4294901760, %v1416_v26  ;;  %v1472_v58 = vsub.f32 %v19_v24, %v62_v34 }
   0xd   :  { %v275_v57 = vand.u32 4294901760, %v274_v47  ;;  %v163_v59 = vand.u32 4294901760, %v162_v48  ;;  %v170_v60 = vand.u32 4294901760, %v169_v49 }
   0xe   :  { %7 = vsyncpa [#allocation3], 0  ;;  %v282_v61 = vand.u32 4294901760, %v281_v51  ;;  %v1474_v62 = vpack.c.bf16 %v116_v52, %v113_v50  ;;  %v1476_v63 = vsub.f32 %v36_v37, %v113_v50  ;;  %v288_v0 = vsub.f32 %v1414_v25, %v1895_v53  ;;  %v38_v5 = vld [vmem:[%s1880_s1 + $0xc0] sm:$0xff]  ;;  %v39_v6 = vld [vmem:[%s1880_s1 + $0xc8] sm:$0xff] }
   0xf   :  { %1145 = vmatpush3.bf16.msra.mxu0 %v1446_v45  ;;  %v1168_v1 = vpack.c.bf16 %v170_v60, %v163_v59  ;;  %v295_v2 = vsub.f32 %v1416_v26, %v1894_v54  ;;  %v65_v3 = vand.u32 4294901760, %v20_v55  ;;  %v68_v4 = vand.u32 4294901760, %v21_v56  ;;  %v22_v11 = vld [vmem:[%s1880_s1 + $0x40] sm:$0xff]  ;;  %v23_v29 = vld [vmem:[%s1880_s1 + $0x48] sm:$0xff] }
  0x10   :  { %v1166_v7 = vpack.c.bf16 %v282_v61, %v275_v57  ;;  %1147 = vmatprep.subr.bf16.mxu0 %v1474_v62  ;;  %v289_v8 = vand.u32 4294901760, %v288_v0  ;;  %v1893_v9 = vand.u32 4294901760, %v1420_v28  ;;  %v1890_v10 = vand.u32 4294901760, %v1433_v38  ;;  %v41_v57 = vld [vmem:[%s1880_s1 + $0xd8] sm:$0xff] }
  0x11   :  { %v1497_v12 = vsub.f32 %v37_v42, %v116_v52  ;;  %v296_v13 = vand.u32 4294901760, %v295_v2  ;;  %v1499_v16 = vpack.c.bf16 %v68_v4, %v65_v3  ;;  %v1501_v17 = vsub.f32 %v20_v55, %v65_v3 }
  0x12   :  { %1167 = vmatprep.subr.bf16.mxu1 %v1166_v7  ;;  %v176_v18 = vsub.f32 %v1420_v28, %v1893_v9  ;;  %v183_v19 = vsub.f32 %v1433_v38, %v1890_v10  ;;  %v119_v23 = vand.u32 4294901760, %v38_v5  ;;  %v122_v24 = vand.u32 4294901760, %v39_v6 }
  0x13   :  { %1169 = vmatpush3.bf16.msra.mxu1 %v1168_v1  ;;  %v1170_v30 = vpack.c.bf16 %v296_v13, %v289_v8  ;;  %1149 = vmatpush3.bf16.msra.mxu0 %v1499_v16  ;;  %v1888_v33 = vand.u32 4294901760, %v1437_v40  ;;  %v1887_v34 = vand.u32 4294901760, %v1443_v43  ;;  %v71_v37 = vand.u32 4294901760, %v22_v11  ;;  %v24_v1 = vld [vmem:[%s1880_s1 + $0x50] sm:$0xff] }
  0x14   :  { %v1515_v42 = vsub.f32 %v21_v56, %v68_v4  ;;  %v177_v47 = vand.u32 4294901760, %v176_v18  ;;  %v184_v48 = vand.u32 4294901760, %v183_v19  ;;  %v1517_v49 = vpack.c.bf16 %v122_v24, %v119_v23  ;;  %v40_v56 = vld [vmem:[%s1880_s1 + $0xd0] sm:$0xff]  ;;  %v25_v18 = vld [vmem:[%s1880_s1 + $0x58] sm:$0xff] }
  0x15   :  { %1171 = vmatprep.subr.bf16.mxu1 %v1170_v30  ;;  %v1519_v50 = vsub.f32 %v38_v5, %v119_v23  ;;  %v302_v51 = vsub.f32 %v1437_v40, %v1888_v33  ;;  %v309_v52 = vsub.f32 %v1443_v43, %v1887_v34  ;;  %v74_v55 = vand.u32 4294901760, %v23_v29 }
  0x16   :  { %v1172_v59 = vpack.c.bf16 %v184_v48, %v177_v47  ;;  %1151 = vmatprep.subr.bf16.mxu0 %v1517_v49  ;;  %v1534_v60 = vsub.f32 %v39_v6, %v122_v24  ;;  %v1885_v61 = vand.u32 4294901760, %v1448_v46  ;;  %v1884_v0 = vand.u32 4294901760, %v1472_v58 }
  0x17   :  { %v303_v2 = vand.u32 4294901760, %v302_v51  ;;  %v310_v3 = vand.u32 4294901760, %v309_v52  ;;  %v1541_v4 = vpack.c.bf16 %v74_v55, %v71_v37  ;;  %v1543_v5 = vsub.f32 %v22_v11, %v71_v37 }
  0x18   :  { %1173 = vmatpush3.bf16.msra.mxu1 %v1172_v59  ;;  %v190_v6 = vsub.f32 %v1448_v46, %v1885_v61  ;;  %v197_v7 = vsub.f32 %v1472_v58, %v1884_v0  ;;  %v125_v8 = vand.u32 4294901760, %v40_v56  ;;  %v128_v13 = vand.u32 4294901760, %v41_v57 }
  0x19   :  { %v1174_v19 = vpack.c.bf16 %v310_v3, %v303_v2  ;;  %1153 = vmatpush3.bf16.msra.mxu0 %v1541_v4  ;;  %v1883_v11 = vand.u32 4294901760, %v1476_v63  ;;  %v1882_v23 = vand.u32 4294901760, %v1497_v12  ;;  %v77_v24 = vand.u32 4294901760, %v24_v1 }
  0x1a   :  { %v1557_v30 = vsub.f32 %v23_v29, %v74_v55  ;;  %v191_v37 = vand.u32 4294901760, %v190_v6  ;;  %v198_v47 = vand.u32 4294901760, %v197_v7  ;;  %v1559_v48 = vpack.c.bf16 %v128_v13, %v125_v8  ;;  %v42_v29 = vld [vmem:[%s1880_s1 + $0xe0] sm:$0xff]  ;;  %v43_v55 = vld [vmem:[%s1880_s1 + $0xe8] sm:$0xff] }
  0x1b   :  { %1175 = vmatprep.subr.bf16.mxu1 %v1174_v19  ;;  %v1561_v51 = vsub.f32 %v40_v56, %v125_v8  ;;  %v316_v52 = vsub.f32 %v1476_v63, %v1883_v11  ;;  %v323_v59 = vsub.f32 %v1497_v12, %v1882_v23  ;;  %v80_v2 = vand.u32 4294901760, %v25_v18  ;;  %v26_v8 = vld [vmem:[%s1880_s1 + $0x60] sm:$0xff] }
  0x1c   :  { %v1176_v3 = vpack.c.bf16 %v198_v47, %v191_v37  ;;  %1155 = vmatprep.subr.bf16.mxu0 %v1559_v48  ;;  %v1576_v56 = vsub.f32 %v41_v57, %v128_v13  ;;  %v1886_v6 = vand.u32 4294901760, %v1501_v17  ;;  %v1889_v7 = vand.u32 4294901760, %v1515_v42 }
  0x1d   :  { %v317_v19 = vand.u32 4294901760, %v316_v52  ;;  %v324_v23 = vand.u32 4294901760, %v323_v59  ;;  %v1583_v11 = vpack.c.bf16 %v80_v2, %v77_v24  ;;  %v1585_v0 = vsub.f32 %v24_v1, %v77_v24  ;;  %v27_v52 = vld [vmem:[%s1880_s1 + $0x68] sm:$0xff] }
  0x1e   :  { %1177 = vmatpush3.bf16.msra.mxu1 %v1176_v3  ;;  %v204_v57 = vsub.f32 %v1501_v17, %v1886_v6  ;;  %v211_v13 = vsub.f32 %v1515_v42, %v1889_v7  ;;  %v131_v37 = vand.u32 4294901760, %v42_v29  ;;  %v134_v47 = vand.u32 4294901760, %v43_v55 }
  0x1f   :  { %1927 = vst [vmem:[#allocation5_spill] sm:$0xff] %v1583_v11  ;;  %v1178_v59 = vpack.c.bf16 %v324_v23, %v317_v19  ;;  %1157 = vmatpush3.bf16.msra.mxu0 %v1583_v11  ;;  %v1892_v1 = vand.u32 4294901760, %v1519_v50  ;;  %v1891_v24 = vand.u32 4294901760, %v1534_v60  ;;  %v83_v3 = vand.u32 4294901760, %v26_v8 }
  0x20   :  { %v1599_v61 = vsub.f32 %v25_v18, %v80_v2  ;;  %v205_v6 = vand.u32 4294901760, %v204_v57  ;;  %v212_v34 = vand.u32 4294901760, %v211_v13  ;;  %v1601_v33 = vpack.c.bf16 %v134_v47, %v131_v37  ;;  %v44_v18 = vld [vmem:[%s1880_s1 + $0xf0] sm:$0xff]  ;;  %v45_v2 = vld [vmem:[%s1880_s1 + $0xf8] sm:$0xff] }
  0x21   :  { %1179 = vmatprep.subr.bf16.mxu1 %v1178_v59  ;;  %v1603_v7 = vsub.f32 %v42_v29, %v131_v37  ;;  %v330_v23 = vsub.f32 %v1519_v50, %v1892_v1  ;;  %v337_v19 = vsub.f32 %v1534_v60, %v1891_v24  ;;  %v86_v10 = vand.u32 4294901760, %v27_v52  ;;  %v28_v59 = vld [vmem:[%s1880_s1 + $0x70] sm:$0xff] }
  0x22   :  { %1928 = vst [vmem:[#allocation6_spill] sm:$0xff] %v1601_v33  ;;  %v1180_v57 = vpack.c.bf16 %v212_v34, %v205_v6  ;;  %1159 = vmatprep.subr.bf16.mxu0 %v1601_v33  ;;  %v1618_v29 = vsub.f32 %v43_v55, %v134_v47  ;;  %v1896_v13 = vand.u32 4294901760, %v1543_v5  ;;  %v1899_v37 = vand.u32 4294901760, %v1557_v30 }
  0x23   :  { %v331_v24 = vand.u32 4294901760, %v330_v23  ;;  %v338_v1 = vand.u32 4294901760, %v337_v19  ;;  %v1625_v9 = vpack.c.bf16 %v86_v10, %v83_v3  ;;  %v1627_v54 = vsub.f32 %v26_v8, %v83_v3  ;;  %v29_v23 = vld [vmem:[%s1880_s1 + $0x78] sm:$0xff] }
  0x24   :  { %1181 = vmatpush3.bf16.msra.mxu1 %v1180_v57  ;;  %v218_v34 = vsub.f32 %v1543_v5, %v1896_v13  ;;  %v225_v55 = vsub.f32 %v1557_v30, %v1899_v37  ;;  %v137_v6 = vand.u32 4294901760, %v44_v18  ;;  %v140_v47 = vand.u32 4294901760, %v45_v2 }
  0x25   :  { %1929 = vst [vmem:[#allocation7_spill] sm:$0xff] %v1625_v9  ;;  %v1182_v19 = vpack.c.bf16 %v338_v1, %v331_v24  ;;  %1161 = vmatpush3.bf16.msra.mxu0 %v1625_v9  ;;  %v1902_v8 = vand.u32 4294901760, %v1561_v51  ;;  %v1901_v3 = vand.u32 4294901760, %v1576_v56  ;;  %v89_v57 = vand.u32 4294901760, %v28_v59 }
  0x26   :  { %v1641_v53 = vsub.f32 %v27_v52, %v86_v10  ;;  %v219_v13 = vand.u32 4294901760, %v218_v34  ;;  %v226_v36 = vand.u32 4294901760, %v225_v55  ;;  %v1643_v35 = vpack.c.bf16 %v140_v47, %v137_v6  ;;  %v13_v10 = vld [vmem:[%s1879_s0 + $0x8] sm:$0xff] }
  0x27   :  { %1183 = vmatprep.subr.bf16.mxu1 %v1182_v19  ;;  %v1645_v37 = vsub.f32 %v44_v18, %v137_v6  ;;  %v344_v1 = vsub.f32 %v1561_v51, %v1902_v8  ;;  %v351_v24 = vsub.f32 %v1576_v56, %v1901_v3  ;;  %v92_v44 = vand.u32 4294901760, %v29_v23  ;;  %v12_v6 = vld [vmem:[%s1879_s0] sm:$0xff]  ;;  %s1351_s0 = smov [#allocation2]  }
  0x28   :  { %1930 = vst [vmem:[#allocation8_spill] sm:$0xff] %v1643_v35  ;;  %v1184_v52 = vpack.c.bf16 %v226_v36, %v219_v13  ;;  %1163 = vmatprep.subr.bf16.mxu0 %v1643_v35  ;;  %v1657_v34 = vsub.f32 %v45_v2, %v140_v47  ;;  %v1906_v18 = vand.u32 4294901760, %v1585_v0  ;;  %v1907_v55 = vand.u32 4294901760, %v1599_v61  ;;  %s916_s20 = sshll.u32 %s1351_s0, 4  ;;  %s917_s20 = int_to_ptr.vmem [resolvable:$true] %s916_s20 }
  0x29   :  { %v345_v19 = vand.u32 4294901760, %v344_v1  ;;  %v352_v3 = vand.u32 4294901760, %v351_v24  ;;  %v1664_v8 = vpack.c.bf16 %v92_v44, %v89_v57  ;;  %v1666_v41 = vsub.f32 %v28_v59, %v89_v57  ;;  %s1327_s21 = scalar_lea.vmem %s917_s20, 128  ;;  %p1332_p1 = scmp.lt.s32.totalorder %s917_s20, %s917_s20 }
  0x2a   :  { %1185 = vmatpush3.bf16.msra.mxu1 %v1184_v52  ;;  %v232_v36 = vsub.f32 %v1585_v0, %v1906_v18  ;;  %v239_v2 = vsub.f32 %v1599_v61, %v1907_v55  ;;  %v1674_v13 = vand.u32 4294901760, %v13_v10  ;;  %v1910_v47 = vand.u32 4294901760, %v1603_v7  ;;  %p1328_p0 = scmp.ne.s32.totalorder %s917_s20, %s1327_s21  ;;  %p1333_p2 = scmp.lt.s32.totalorder %s1327_s21, %s1327_s21 }
  0x2b   :  { %1931 = vst [vmem:[#allocation9_spill] sm:$0xff] %v1664_v8  ;;  %v1186_v35 = vpack.c.bf16 %v352_v3, %v345_v19  ;;  %1165 = vmatpush3.bf16.msra.mxu0 %v1664_v8  ;;  %v1916_v1 = vand.u32 4294901760, %v1618_v29  ;;  %v1198_v59 = vpack.c.bf16 %v1425_v32, %v1423_v31  ;;  %v1681_v57 = vand.u32 4294901760, %v12_v6 }
  0x2c   :  { %1932 = vst [vmem:[#allocation10_spill] sm:$0xff] %v1674_v13  ;;  %v233_v24 = vand.u32 4294901760, %v232_v36  ;;  %v240_v52 = vand.u32 4294901760, %v239_v2  ;;  %v1684_v18 = vsub.f32 %v13_v10, %v1674_v13  ;;  %v358_v55 = vsub.f32 %v1603_v7, %v1910_v47  ;;  %383 = vmatprep.mubr.f32.mxu1 %v1674_v13  ;;  %p1334_p3 = por %p1333_p2, %p1332_p1 }
  0x2d   :  { %1187 = vmatprep.subr.bf16.mxu1 %v1186_v35  ;;  %v365_v3 = vsub.f32 %v1618_v29, %v1916_v1  ;;  %1199 = vmatprep.subr.bf16.mxu0 %v1198_v59  ;;  %v1694_v19 = vsub.f32 %v12_v6, %v1681_v57  ;;  %v1915_v36 = vand.u32 4294901760, %v1627_v54  ;;  %v1917_v10 = vand.u32 4294901760, %v1641_v53 }
  0x2e   :  { %v1698_v2 = vsub.f32 %v29_v23, %v92_v44  ;;  %v1188_v8 = vpack.c.bf16 %v240_v52, %v233_v24  ;;  %v1918_v47 = vand.u32 4294901760, %v1684_v18  ;;  %v359_v9 = vand.u32 4294901760, %v358_v55  ;;  %p1335_p4 = pnand %p1334_p3, %p1328_p0 }
  0x2f   :  { %v366_v13 = vand.u32 4294901760, %v365_v3  ;;  %v150_v35 = vand.u32 4294901760, %v1694_v19  ;;  %v246_v59 = vsub.f32 %v1627_v54, %v1915_v36  ;;  %v253_v6 = vsub.f32 %v1641_v53, %v1917_v10 }
  0x30   :  { %1189 = vmatpush3.bf16.msra.mxu1 %v1188_v8  ;;  %v145_v44 = vsub.f32 %v1684_v18, %v1918_v47  ;;  %v1200_v23 = vpack.c.bf16 %v1403_v21, %v1393_v15  ;;  %v1923_v55 = vand.u32 4294901760, %v1645_v37  ;;  %v1926_v24 = vand.u32 4294901760, %v1657_v34 }
  0x31   :  { %v1190_v52 = vpack.c.bf16 %v366_v13, %v359_v9  ;;  %v151_v3 = vsub.f32 %v1694_v19, %v150_v35  ;;  %v247_v36 = vand.u32 4294901760, %v246_v59  ;;  %v254_v1 = vand.u32 4294901760, %v253_v6 }
  0x32   :  { %v146_v10 = vand.u32 4294901760, %v145_v44  ;;  %v372_v8 = vsub.f32 %v1645_v37, %v1923_v55  ;;  %v379_v47 = vsub.f32 %v1657_v34, %v1926_v24  ;;  %v1925_v33 = vand.u32 4294901760, %v1666_v41 }
  0x33   :  { %1191 = vmatprep.subr.bf16.mxu1 %v1190_v52  ;;  %v152_v11 = vand.u32 4294901760, %v151_v3  ;;  %v1192_v9 = vpack.c.bf16 %v254_v1, %v247_v36  ;;  %v1202_v13 = vpack.c.bf16 %v1416_v26, %v1414_v25  ;;  %v1924_v59 = vand.u32 4294901760, %v1698_v2 }
  0x34   :  { %147 = vmatprep.mubr.f32.mxu0 %v146_v10  ;;  %v373_v6 = vand.u32 4294901760, %v372_v8  ;;  %v380_v44 = vand.u32 4294901760, %v379_v47  ;;  %v260_v55 = vsub.f32 %v1666_v41, %v1925_v33  ;;  %v1204_v3 = vpack.c.bf16 %v1433_v38, %v1420_v28 }
  0x35   :  { %153 = vmatmul.mubr.f32.vlgmr.msra.gmra.mrb[0].mxu0 %v152_v11  ;;  %1193 = vmatpush3.bf16.msra.mxu1 %v1192_v9  ;;  %v267_v52 = vsub.f32 %v1698_v2, %v1924_v59  ;;  %v1206_v10 = vpack.c.bf16 %v1443_v43, %v1437_v40  ;;  %v1208_v11 = vpack.c.bf16 %v1472_v58, %v1448_v46  ;;  %v1934_v9 = vand.u32 4294901760, %v1425_v32 }
  0x36   :  { %1201 = vmatpush3.bf16.msra.mxu0 %v1200_v23  ;;  %v1194_v1 = vpack.c.bf16 %v380_v44, %v373_v6  ;;  %v261_v36 = vand.u32 4294901760, %v260_v55  ;;  %520 = vmatprep.mubr.f32.mxu0 %v1684_v18  ;;  %v1210_v8 = vpack.c.bf16 %v1497_v12, %v1476_v63  ;;  %v1933_v55 = vand.u32 4294901760, %v1423_v31 }
  0x37   :  { %1203 = vmatprep.subr.bf16.mxu0 %v1202_v13  ;;  %v268_v47 = vand.u32 4294901760, %v267_v52  ;;  %v1935_v44 = vand.u32 4294901760, %v1393_v15  ;;  %v1936_v13 = vand.u32 4294901760, %v1403_v21  ;;  %v1937_v59 = vand.u32 4294901760, %v1414_v25 }
  0x38   :  { %1195 = vmatprep.subr.bf16.mxu1 %v1194_v1  ;;  %v1262_v6 = vpack.c.bf16 %v1934_v9, %v1933_v55  ;;  %v1938_v1 = vand.u32 4294901760, %v1416_v26  ;;  %v1939_v24 = vand.u32 4294901760, %v1420_v28  ;;  %v1941_v31 = vand.u32 4294901760, %v1437_v40 }
  0x39   :  { %v1196_v23 = vpack.c.bf16 %v268_v47, %v261_v36  ;;  %v1264_v52 = vpack.c.bf16 %v1936_v13, %v1935_v44  ;;  %v1940_v36 = vand.u32 4294901760, %v1433_v38  ;;  %v1942_v32 = vand.u32 4294901760, %v1443_v43  ;;  %v1957_v13 = vld [vmem:[#allocation7_spill] sm:$0xff] }
  0x3a   :  { %v1266_v33 = vpack.c.bf16 %v1938_v1, %v1937_v59  ;;  %1205 = vmatpush3.bf16.msra.mxu0 %v1204_v3  ;;  %v1943_v15 = vand.u32 4294901760, %v1448_v46  ;;  %v1944_v21 = vand.u32 4294901760, %v1472_v58  ;;  %v1945_v25 = vand.u32 4294901760, %v1476_v63  ;;  %v1958_v1 = vld [vmem:[#allocation8_spill] sm:$0xff] }
  0x3b   :  { %v1268_v47 = vpack.c.bf16 %v1940_v36, %v1939_v24  ;;  %v1270_v55 = vpack.c.bf16 %v1942_v32, %v1941_v31  ;;  %v1946_v26 = vand.u32 4294901760, %v1497_v12  ;;  %1197 = vmatpush3.bf16.msra.mxu1 %v1196_v23  ;;  %1207 = vmatprep.subr.bf16.mxu0 %v1206_v10  ;;  %v1947_v28 = vand.u32 4294901760, %v1501_v17  ;;  %v1959_v36 = vld [vmem:[#allocation9_spill] sm:$0xff] }
  0x3c   :  { %v1272_v9 = vpack.c.bf16 %v1944_v21, %v1943_v15  ;;  %v1948_v38 = vand.u32 4294901760, %v1515_v42  ;;  %v1949_v43 = vand.u32 4294901760, %v1519_v50  ;;  %v1950_v24 = vand.u32 4294901760, %v1534_v60  ;;  %1231 = vmatprep.subr.bf16.mxu1 %v1391_v14 }
  0x3d   :  { %v1274_v59 = vpack.c.bf16 %v1946_v26, %v1945_v25  ;;  %v1951_v58 = vand.u32 4294901760, %v1543_v5  ;;  %v1952_v3 = vand.u32 4294901760, %v1557_v30  ;;  %v1212_v12 = vpack.c.bf16 %v1515_v42, %v1501_v17 }
  0x3e   :  { %v1276_v40 = vpack.c.bf16 %v1948_v38, %v1947_v28  ;;  %v1278_v46 = vpack.c.bf16 %v1950_v24, %v1949_v43  ;;  %385 = vmatmul.mubr.f32.vlgmr.msra.gmra.mrb[0].mxu1 %v1681_v57  ;;  %1209 = vmatpush3.bf16.msra.mxu0 %v1208_v11  ;;  %v1214_v10 = vpack.c.bf16 %v1534_v60, %v1519_v50  ;;  %v1953_v23 = vand.u32 4294901760, %v1684_v18  ;;  %v1954_v18 = vld [vmem:[#allocation5_spill] sm:$0xff]  ;;  %v1955_v11 = vld [vmem:[#allocation6_spill] sm:$0xff] }
  0x3f   :  { %v1280_v63 = vpack.c.bf16 %v1952_v3, %v1951_v58  ;;  %1233 = vmatpush3.bf16.msra.mxu1 %v1401_v20  ;;  %1211 = vmatprep.subr.bf16.mxu0 %v1210_v8  ;;  %v1216_v44 = vpack.c.bf16 %v1557_v30, %v1543_v5  ;;  %v1218_v17 = vpack.c.bf16 %v1576_v56, %v1561_v51  ;;  %v1956_v8 = vld [vmem:[#allocation10_spill] sm:$0xff]  ;;  %vm908_vm0 = vcmask 662528  }
  0x40   :  { %1235 = vmatprep.subr.bf16.mxu1 %v1405_v22  ;;  %627 = vmatprep.mubr.f32.mxu1 %v1953_v23  ;;  %v1220_v42 = vpack.c.bf16 %v1599_v61, %v1585_v0  ;;  %v1222_v50 = vpack.c.bf16 %v1618_v29, %v1603_v7  ;;  %v1224_v60 = vpack.c.bf16 %v1641_v53, %v1627_v54 }
  0x41   :  { %v1226_v5 = vpack.c.bf16 %v1657_v34, %v1645_v37  ;;  %v1228_v30 = vpack.c.bf16 %v1698_v2, %v1666_v41 }
  0x42   :  { %1213 = vmatpush3.bf16.msra.mxu0 %v1212_v12 }
  0x43   :  { %1237 = vmatpush3.bf16.msra.mxu1 %v1418_v27  ;;  %1215 = vmatprep.subr.bf16.mxu0 %v1214_v10 }
  0x44   :  { %1239 = vmatprep.subr.bf16.mxu1 %v1435_v39 }
  0x46   :  { %1217 = vmatpush3.bf16.msra.mxu0 %v1216_v44 }
  0x47   :  { %1241 = vmatpush3.bf16.msra.mxu1 %v1446_v45  ;;  %1219 = vmatprep.subr.bf16.mxu0 %v1218_v17 }
  0x48   :  { %1243 = vmatprep.subr.bf16.mxu1 %v1474_v62 }
  0x4a   :  { %1221 = vmatpush3.bf16.msra.mxu0 %v1220_v42 }
  0x4b   :  { %1245 = vmatpush3.bf16.msra.mxu1 %v1499_v16  ;;  %1223 = vmatprep.subr.bf16.mxu0 %v1222_v50 }
  0x4c   :  { %1247 = vmatprep.subr.bf16.mxu1 %v1517_v49 }
  0x4e   :  { %1225 = vmatpush3.bf16.msra.mxu0 %v1224_v60 }
  0x4f   :  { %1249 = vmatpush3.bf16.msra.mxu1 %v1541_v4  ;;  %1227 = vmatprep.subr.bf16.mxu0 %v1226_v5 }
  0x50   :  { %1251 = vmatprep.subr.bf16.mxu1 %v1559_v48 }
  0x52   :  { %1229 = vmatpush3.bf16.msra.mxu0 %v1228_v30 }
  0x53   :  { %1253 = vmatpush3.bf16.msra.mxu1 %v1954_v18  ;;  %1263 = vmatprep.subr.bf16.mxu0 %v1262_v6  ;;  %v1961_v6 = vand.u32 4294901760, %v1576_v56 }
  0x54   :  { %1255 = vmatprep.subr.bf16.mxu1 %v1955_v11 }
  0x55   :  { %523 = vmatmul.mubr.f32.vlgmr.msra.gmra.mrb[2].mxu0 %v1694_v19  ;;  %v1962_v19 = vand.u32 4294901760, %v1585_v0 }
  0x56   :  { %1265 = vmatpush3.bf16.msra.mxu0 %v1264_v52  ;;  %797 = vmatprep.mubr.f32.mxu0 %v1956_v8 }
  0x57   :  { %1257 = vmatpush3.bf16.msra.mxu1 %v1957_v13  ;;  %1267 = vmatprep.subr.bf16.mxu0 %v1266_v33  ;;  %v1960_v33 = vand.u32 4294901760, %v1561_v51  ;;  %v1966_v51 = vand.u32 4294901760, %v1627_v54 }
  0x58   :  { %1259 = vmatprep.subr.bf16.mxu1 %v1958_v1 }
  0x5a   :  { %1269 = vmatpush3.bf16.msra.mxu0 %v1268_v47 }
  0x5b   :  { %1261 = vmatpush3.bf16.msra.mxu1 %v1959_v36  ;;  %1271 = vmatprep.subr.bf16.mxu0 %v1270_v55 }
  0x5c   :  { %1295 = vmatprep.subr.bf16.mxu1 %v1391_v14  ;;  %v1282_v14 = vpack.c.bf16 %v1961_v6, %v1960_v33 }
  0x5e   :  { %631 = vmatmul.mubr.f32.vlgmr.msra.gmra.mrb[2].mxu1 %v150_v35  ;;  %1273 = vmatpush3.bf16.msra.mxu0 %v1272_v9 }
  0x5f   :  { %1297 = vmatpush3.bf16.msra.mxu1 %v1401_v20  ;;  %1275 = vmatprep.subr.bf16.mxu0 %v1274_v59  ;;  %v1963_v20 = vand.u32 4294901760, %v1599_v61  ;;  %v1968_v61 = vand.u32 4294901760, %v1645_v37 }
  0x60   :  { %1299 = vmatprep.subr.bf16.mxu1 %v1405_v22  ;;  %901 = vmatprep.mubr.f32.mxu1 %v1956_v8  ;;  %v1964_v22 = vand.u32 4294901760, %v1603_v7  ;;  %v1970_v7 = vand.u32 4294901760, %v1666_v41 }
  0x61   :  { %v1284_v35 = vpack.c.bf16 %v1963_v20, %v1962_v19 }
  0x62   :  { %1277 = vmatpush3.bf16.msra.mxu0 %v1276_v40 }
  0x63   :  { %1301 = vmatpush3.bf16.msra.mxu1 %v1418_v27  ;;  %1279 = vmatprep.subr.bf16.mxu0 %v1278_v46  ;;  %v1965_v27 = vand.u32 4294901760, %v1618_v29 }
  0x64   :  { %1303 = vmatprep.subr.bf16.mxu1 %v1435_v39  ;;  %v1967_v39 = vand.u32 4294901760, %v1641_v53 }
  0x65   :  { %v1286_v52 = vpack.c.bf16 %v1965_v27, %v1964_v22 }
  0x66   :  { %1281 = vmatpush3.bf16.msra.mxu0 %v1280_v63  ;;  %v1288_v56 = vpack.c.bf16 %v1967_v39, %v1966_v51 }
  0x67   :  { %1305 = vmatpush3.bf16.msra.mxu1 %v1446_v45  ;;  %1283 = vmatprep.subr.bf16.mxu0 %v1282_v14  ;;  %v1969_v45 = vand.u32 4294901760, %v1657_v34 }
  0x68   :  { %1307 = vmatprep.subr.bf16.mxu1 %v1474_v62  ;;  %v1971_v62 = vand.u32 4294901760, %v1698_v2 }
  0x69   :  { %v1290_v0 = vpack.c.bf16 %v1969_v45, %v1968_v61 }
  0x6a   :  { %1285 = vmatpush3.bf16.msra.mxu0 %v1284_v35  ;;  %v1292_v29 = vpack.c.bf16 %v1971_v62, %v1970_v7 }
  0x6b   :  { %1309 = vmatpush3.bf16.msra.mxu1 %v1499_v16  ;;  %1287 = vmatprep.subr.bf16.mxu0 %v1286_v52 }
  0x6c   :  { %1311 = vmatprep.subr.bf16.mxu1 %v1517_v49 }
  0x6e   :  { %1289 = vmatpush3.bf16.msra.mxu0 %v1288_v56 }
  0x6f   :  { %1313 = vmatpush3.bf16.msra.mxu1 %v1541_v4  ;;  %1291 = vmatprep.subr.bf16.mxu0 %v1290_v0 }
  0x70   :  { %1315 = vmatprep.subr.bf16.mxu1 %v1559_v48 }
  0x72   :  { %1293 = vmatpush3.bf16.msra.mxu0 %v1292_v29 }
  0x73   :  { %1317 = vmatpush3.bf16.msra.mxu1 %v1954_v18 }
  0x74   :  { %1319 = vmatprep.subr.bf16.mxu1 %v1955_v11 }
  0x75   :  { %799 = vmatmul.mubr.f32.vlgmr.msra.gmra.mrb[4].mxu0 %v1681_v57 }
  0x77   :  { %1321 = vmatpush3.bf16.msra.mxu1 %v1957_v13 }
  0x78   :  { %1323 = vmatprep.subr.bf16.mxu1 %v1958_v1 }
  0x7b   :  { %1325 = vmatpush3.bf16.msra.mxu1 %v1959_v36 }
  0x7e   :  { %903 = vmatmul.mubr.f32.vlgmr.msra.gmra.mrb[4].mxu1 %v1681_v57 }
 0x108   :  { %v956_v41 = vpop.f32.mrb[0].mxu0 }
 0x109   :  { %v957_v53 = vpop.f32.mrb[1].mxu0 }
 0x10a   :  { %v958_v54 = vadd.f32 %v957_v53, %v956_v41 }
 0x111   :  { %v991_v16 = vpop.f32.mrb[0].mxu1 }
 0x112   :  { %v992_v49 = vpop.f32.mrb[1].mxu1 }
 0x113   :  { %v993_v4 = vadd.f32 %v992_v49, %v991_v16 }
 0x115   :  { %v387_v48 = vadd.f32 %v993_v4, %v958_v54 }
 0x128   :  { %v1026_v37 = vpop.f32.mrb[2].mxu0 }
 0x129   :  { %v1027_v34 = vpop.f32.mrb[3].mxu0 }
 0x12a   :  { %v1028_v2 = vadd.f32 %v1027_v34, %v1026_v37 }
 0x12c   :  { %v525_v47 = vadd.f32 %v1028_v2, %v387_v48 }
 0x131   :  { %v1061_v31 = vpop.f32.mrb[2].mxu1 }
 0x132   :  { %v1062_v32 = vpop.f32.mrb[3].mxu1 }
 0x133   :  { %v1063_v55 = vadd.f32 %v1062_v32, %v1061_v31 }
 0x135   :  { %v633_v15 = vadd.f32 %v1063_v55, %v525_v47 }
 0x148   :  { %v1096_v21 = vpop.f32.mrb[4].mxu0 }
 0x149   :  { %v1097_v9 = vpop.f32.mrb[5].mxu0 }
 0x14a   :  { %v1098_v25 = vadd.f32 %v1097_v9, %v1096_v21 }
 0x14c   :  { %v801_v26 = vadd.f32 %v1098_v25, %v633_v15 }
 0x151   :  { %v1131_v57 = vpop.f32.mrb[4].mxu1 }
 0x152   :  { %v1132_v59 = vpop.f32.mrb[5].mxu1 }
 0x153   :  { %v1133_v28 = vadd.f32 %v1132_v59, %v1131_v57 }
 0x155   :  { %v905_v38 = vadd.f32 %v1133_v28, %v801_v26 }
 0x157   :  { %909 = vst.msk [vmem:[#allocation2] sm:$0xff] %vm908_vm0, %v905_v38 }
 0x158   :  { %1338 = shalt.err (!%p1335_p4)
}
 0x159   :  { %s1339_s24 = scalar_lea.hbm %s1881_s2, 128 }
 0x15a   :  { %p1340_p5 = scmp.ne.s32.totalorder %s1881_s2, %s1339_s24  ;;  %p1343_p6 = scmp.lt.u32.totalorder %s1339_s24, %s1881_s2 }
 0x15c   :  { %p1345_p7 = pnand %p1343_p6, %p1340_p5 }
 0x15e   :  { %1348 = shalt.err (!%p1345_p7)
}
 0x15f   :  { %919 = dma.vmem_to_hbm [thread:$0]  %s917_s20, 128, %s1881_s2, [#allocation3]  }
 0x160   :  { %1349 = dma.done.wait [#allocation3], 128  }
 0x161   :  { %1350 = vsyncadd [#allocation3], 4294967168 }
 0x162   :  { %923 = vsyncpa [#allocation3], 1 }

</bundles_post_ra>
